<compile_context>
chip_gen: v5e
topology: v5e:2x2
jax: 0.10.0
libtpu: 0.0.40
codegen_flags: <defaults>
</compile_context>

<pallas_src>
import functools

import jax
import jax.numpy as jnp
from jax.experimental import pallas as pl
from jax.experimental.pallas import tpu as pltpu


def _round_up(x: int, m: int) -> int:
    return ((x + m - 1) // m) * m


def _perceptron_kernel(x_ref, w_ref, b_ref, o_ref, acc_ref, *, apply_sigmoid: bool):
    """One (batch-tile, K-tile) step of y = x @ w.T + b [+ sigmoid].

    x_ref:   (TILE_B, TILE_K)  VMEM
    w_ref:   (1, TILE_K)       VMEM (row layout, lane-dense)
    b_ref:   (1, 1)            SMEM scalar
    o_ref:   (1, TILE_B)       VMEM (lane-dense output row)
    acc_ref: (1, TILE_B)       VMEM f32 accumulator (scratch)
    """
    k = pl.program_id(1)

    @pl.when(k == 0)
    def _init():
        acc_ref[...] = jnp.zeros_like(acc_ref)

    # (1, K_t) contracted with (B_t, K_t) over K  ->  (1, B_t), lane-dense.
    acc_ref[...] += jax.lax.dot_general(
        w_ref[...],
        x_ref[...],
        dimension_numbers=(((1,), (1,)), ((), ())),
        preferred_element_type=jnp.float32,
    )

    @pl.when(k == pl.num_programs(1) - 1)
    def _finalize():
        y = acc_ref[...] + b_ref[0, 0]
        if apply_sigmoid:
            y = jax.nn.sigmoid(y)
        o_ref[...] = y.astype(o_ref.dtype)


def review_classifier_forward(
    x,
    weight,
    bias,
    apply_sigmoid: bool = False,
    *,
    max_tile_b: int = 512,
    max_tile_k: int = 2048,
):
    """Forward pass of ReviewClassifier.

    Args:
      x:      (batch, num_features) float32
      weight: (1, num_features) float32   (PyTorch nn.Linear layout)
      bias:   (1,) float32
      apply_sigmoid: static flag, matches the PyTorch module.
      max_tile_b / max_tile_k: tile-size caps (multiples of 128 required when
        they actually tile; defaults keep each x block at 512*2048*4B = 4 MiB,
        ~8 MiB double-buffered, safe on v5e/v6e/v7x VMEM).

    Returns:
      (batch,) float32
    """
    batch, num_features = x.shape
    x = x.astype(jnp.float32)
    w = weight.reshape(1, num_features).astype(jnp.float32)   # keep (1, K) row layout
    b = bias.reshape(1, 1).astype(jnp.float32)

    # --- tile selection -------------------------------------------------------
    if batch <= max_tile_b:
        tile_b = _round_up(batch, 8)          # single batch tile == full padded dim
    else:
        assert max_tile_b % 128 == 0, "tiled batch tile must be lane-aligned (128)"
        tile_b = max_tile_b
    b_pad = _round_up(batch, tile_b)

    if num_features <= max_tile_k:
        tile_k = num_features                 # full-extent K block (no 128 constraint)
    else:
        assert max_tile_k % 128 == 0, "tiled K tile must be lane-aligned (128)"
        tile_k = max_tile_k
    k_pad = _round_up(num_features, tile_k)

    # Zero-pad: padded K columns contribute 0 to the dot; padded batch rows are
    # sliced off below.
    if b_pad != batch or k_pad != num_features:
        x = jnp.pad(x, ((0, b_pad - batch), (0, k_pad - num_features)))
    if k_pad != num_features:
        w = jnp.pad(w, ((0, 0), (0, k_pad - num_features)))

    grid = (b_pad // tile_b, k_pad // tile_k)   # (parallel batch, arbitrary K-reduction)

    kernel = functools.partial(_perceptron_kernel, apply_sigmoid=apply_sigmoid)

    out = pl.pallas_call(
        kernel,
        out_shape=jax.ShapeDtypeStruct((1, b_pad), jnp.float32),
        grid=grid,
        in_specs=[
            pl.BlockSpec((tile_b, tile_k), lambda i, k: (i, k)),        # x tile
            pl.BlockSpec((1, tile_k), lambda i, k: (0, k)),             # weight row tile
            pl.BlockSpec(memory_space=pltpu.MemorySpace.SMEM),          # bias scalar
        ],
        out_specs=pl.BlockSpec((1, tile_b), lambda i, k: (0, i)),       # lane-dense output
        scratch_shapes=[pltpu.VMEM((1, tile_b), jnp.float32)],          # accumulator
        compiler_params=pltpu.CompilerParams(
            dimension_semantics=("parallel", "arbitrary"),
            vmem_limit_bytes=32 * 1024 * 1024,
        ),
    )(x, w, b)

    # .squeeze() in PyTorch drops the size-1 output dim -> (batch,)
    return out[0, :batch]


def _reference_forward(x, weight, bias, apply_sigmoid=False):
    y = jnp.dot(x, weight.T, precision=jax.lax.Precision.HIGHEST)[:, 0] + bias[0]
    if apply_sigmoid:
        y = jax.nn.sigmoid(y)
    return y


def _check(batch, num_features, key, **tile_kwargs):
    kx, kw, kb = jax.random.split(key, 3)
    x = jax.random.normal(kx, (batch, num_features), dtype=jnp.float32)
    bound = 1.0 / jnp.sqrt(num_features)
    weight = jax.random.uniform(
        kw, (1, num_features), minval=-bound, maxval=bound, dtype=jnp.float32
    )
    bias = jax.random.uniform(
        kb, (1,), minval=-bound, maxval=bound, dtype=jnp.float32
    )

    for apply_sigmoid in (False, True):
        y = jax.block_until_ready(
            review_classifier_forward(
                x, weight, bias, apply_sigmoid=apply_sigmoid, **tile_kwargs
            )
        )
        y_ref = _reference_forward(x, weight, bias, apply_sigmoid=apply_sigmoid)
        assert y.shape == (batch,)
        assert jnp.allclose(y, y_ref, atol=1e-4, rtol=1e-4), (
            f"mismatch batch={batch} K={num_features} sigmoid={apply_sigmoid}"
        )


if __name__ == "__main__":
    key = jax.random.PRNGKey(0)
    k1, k2 = jax.random.split(key)

    # Small shape matching the module (single tile, full-K block).
    _check(batch=8, num_features=32, key=k1)

    # Non-divisible shape with small tile caps to exercise batch padding,
    # multiple batch tiles, and the K-reduction accumulator path.
    _check(batch=300, num_features=200, key=k2, max_tile_b=128, max_tile_k=128)

    print("KERNEL_OK")
</pallas_src>

<mosaic_0001>
module attributes {stable_mosaic.version = 11 : i64} {
  func.func @_perceptron_kernel(%arg0: i32, %arg1: i32, %arg2: memref<8x32xf32, #tpu.memory_space<vmem>>, %arg3: memref<1x32xf32, #tpu.memory_space<vmem>>, %arg4: memref<1x1xf32, #tpu.memory_space<smem>>, %arg5: memref<1x8xf32, #tpu.memory_space<vmem>>, %arg6: memref<1x8xf32, #tpu.memory_space<vmem>>) attributes {dimension_semantics = [#tpu.dimension_semantics<parallel>, #tpu.dimension_semantics<arbitrary>], iteration_bounds = array<i64: 1, 1>, scalar_prefetch = 0 : i64, scratch_operands = 1 : i64, tpu.core_type = #tpu.core_type<tc>, window_params = [{transform_indices = @transform_0, window_bounds = array<i64: 8, 32>}, {transform_indices = @transform_1, window_bounds = array<i64: 1, 32>}, {transform_indices = @transform_2, window_bounds = array<i64: 1, 1>}, {transform_indices = @transform_3, window_bounds = array<i64: 1, 8>}]} {
    %c0_i32 = arith.constant 0 : i32
    %0 = arith.cmpi eq, %arg1, %c0_i32 : i32
    %1 = arith.extui %0 : i1 to i32
    %c0_i32_0 = arith.constant 0 : i32
    %2 = arith.cmpi ne, %1, %c0_i32_0 : i32
    scf.if %2 {
      %cst_10 = arith.constant 0.000000e+00 : f32
      %12 = vector.broadcast %cst_10 : f32 to vector<1x8xf32>
      %c0_11 = arith.constant 0 : index
      %c0_12 = arith.constant 0 : index
      %13 = vector.load %arg6[%c0_11, %c0_12] : memref<1x8xf32, #tpu.memory_space<vmem>>, vector<1x8xf32>
      tpu.vector_store %arg6[%c0_11, %c0_12], %12 {strides = array<i32>} : memref<1x8xf32, #tpu.memory_space<vmem>>, vector<1x8xf32>,
    } else {
    }
    %c0 = arith.constant 0 : index
    %c0_1 = arith.constant 0 : index
    %3 = vector.load %arg6[%c0, %c0_1] : memref<1x8xf32, #tpu.memory_space<vmem>>, vector<1x8xf32>
    %c0_2 = arith.constant 0 : index
    %c0_3 = arith.constant 0 : index
    %4 = vector.load %arg3[%c0_2, %c0_3] : memref<1x32xf32, #tpu.memory_space<vmem>>, vector<1x32xf32>
    %c0_4 = arith.constant 0 : index
    %c0_5 = arith.constant 0 : index
    %5 = vector.load %arg2[%c0_4, %c0_5] : memref<8x32xf32, #tpu.memory_space<vmem>>, vector<8x32xf32>
    %cst = arith.constant dense<0.000000e+00> : vector<1x8xf32>
    %6 = tpu.matmul %4, %5, %cst {dimension_numbers = #tpu.dot_dimension_numbers<[1], [1], [0], [0], [0, 0, 1, 0], [], []>} : vector<1x32xf32>, vector<8x32xf32>, vector<1x8xf32> -> vector<1x8xf32>
    %7 = arith.addf %3, %6 : vector<1x8xf32>
    %c0_6 = arith.constant 0 : index
    %c0_7 = arith.constant 0 : index
    %8 = vector.load %arg6[%c0_6, %c0_7] : memref<1x8xf32, #tpu.memory_space<vmem>>, vector<1x8xf32>
    tpu.vector_store %arg6[%c0_6, %c0_7], %7 {strides = array<i32>} : memref<1x8xf32, #tpu.memory_space<vmem>>, vector<1x8xf32>,
    %c0_i32_8 = arith.constant 0 : i32
    %9 = arith.cmpi eq, %arg1, %c0_i32_8 : i32
    %10 = arith.extui %9 : i1 to i32
    %c0_i32_9 = arith.constant 0 : i32
    %11 = arith.cmpi ne, %10, %c0_i32_9 : i32
    scf.if %11 {
      %c0_10 = arith.constant 0 : index
      %c0_11 = arith.constant 0 : index
      %12 = vector.load %arg6[%c0_10, %c0_11] : memref<1x8xf32, #tpu.memory_space<vmem>>, vector<1x8xf32>
      %c0_12 = arith.constant 0 : index
      %c0_13 = arith.constant 0 : index
      %13 = memref.load %arg4[%c0_12, %c0_13] : memref<1x1xf32, #tpu.memory_space<smem>>
      %14 = vector.broadcast %13 : f32 to vector<1x8xf32>
      %15 = arith.addf %12, %14 : vector<1x8xf32>
      %c0_14 = arith.constant 0 : index
      %c0_15 = arith.constant 0 : index
      %16 = vector.load %arg5[%c0_14, %c0_15] : memref<1x8xf32, #tpu.memory_space<vmem>>, vector<1x8xf32>
      tpu.vector_store %arg5[%c0_14, %c0_15], %15 {strides = array<i32>} : memref<1x8xf32, #tpu.memory_space<vmem>>, vector<1x8xf32>,
    } else {
    }
    return
  }
  func.func @transform_0(%arg0: i32, %arg1: i32) -> (i32, i32) {
    %c0_i32 = arith.constant 0 : i32
    return %arg0, %arg1 : i32, i32
  }
  func.func @transform_1(%arg0: i32, %arg1: i32) -> (i32, i32) {
    %c0_i32 = arith.constant 0 : i32
    %c0_i32_0 = arith.constant 0 : i32
    return %c0_i32, %arg1 : i32, i32
  }
  func.func @transform_2(%arg0: i32, %arg1: i32) -> (i32, i32) {
    %c0_i32 = arith.constant 0 : i32
    %c0_i32_0 = arith.constant 0 : i32
    %c0_i32_1 = arith.constant 0 : i32
    return %c0_i32, %c0_i32_0 : i32, i32
  }
  func.func @transform_3(%arg0: i32, %arg1: i32) -> (i32, i32) {
    %c0_i32 = arith.constant 0 : i32
    %c0_i32_0 = arith.constant 0 : i32
    return %c0_i32, %arg0 : i32, i32
  }
}

</mosaic_0001>

<bundles_post_ra>
// kernel: tpu_custom_call.1
= control target key start
LH: loop header
LB: loop body
LE: loop exit
PB: predicated region body
PF: predicated region fallthrough
CT: control target
= control target key end

     0   :  { %9 = vsyncpa [#allocation5], 0  ;;  %s189_s0 = inlined_call_operand.hbm [shape: f32[8,32], index: 0, kind: input, shape index: {}]   ;;  %s190_s1 = inlined_call_operand.vmem [shape: f32[1,32], index: 1, kind: input, shape index: {}]   ;;  %s191_s2 = inlined_call_operand.<no memory space> [shape: f32[1,1], index: 2, kind: input, shape index: {}]   ;;  %s192_s3 = inlined_call_operand.hbm [shape: f32[1,8], index: 3, kind: output, shape index: {}]  }
   0x1   :  { %10 = vsyncpa [#allocation6], 0  ;;  %s16_s14 = sshll.u32 %s189_s0, 4  ;;  %s151_s15 = smov [#allocation4]   ;;  %s17_s14 = int_to_ptr.hbm [resolvable:$true] %s16_s14 }
   0x2   :  { %s18_s16 = sshll.u32 %s151_s15, 4  ;;  %s19_s16 = int_to_ptr.vmem [resolvable:$true] %s18_s16 }
   0x3   :  { %21 = dma.hbm_to_vmem [thread:$0]  %s17_s14, 128, %s19_s16, [#allocation5]  }
   0x4   :  { %147 = dma.done.wait [#allocation5], 128  }
   0x5   :  { %148 = vsyncadd [#allocation5], 4294967168  ;;  %vm34_vm0 = vcmask 57344   ;;  %v152_v0 = vmov 0.0   ;;  %vm39_vm1 = vcmask 261120   ;;  %v38_v1 = vld [vmem:[#allocation4] sm:$0xff]  ;;  %v74_v6 = vstv %s191_s2 }
   0x6   :  { %35 = vst.msk [vmem:[#allocation2] sm:$0x1] %vm34_vm0, %v152_v0  ;;  %94 = vmatpush.xpose.msk.msra.mxu0 %vm39_vm1, %v38_v1  ;;  %v37_v2 = vld [vmem:[%s190_s1] sm:$0x1]  ;;  %s153_s20 = smov [#allocation7]   ;;  %s84_s24 = sshll.u32 %s192_s3, 4  ;;  %s85_s24 = int_to_ptr.hbm [resolvable:$true] %s84_s24 }
   0x7   :  { %s82_s21 = sshll.u32 %s153_s20, 4  ;;  %s83_s21 = int_to_ptr.vmem [resolvable:$true] %s82_s21 }
   0x9   :  { %95 = vmatmul.msk.f32.vlgmr.msra.gmra.mxu0 %vm39_vm1, %v37_v2 }
   0xd   :  { %v36_v3 = vld [vmem:[#allocation2] sm:$0x1] }
  0x86   :  { %v63_v4 = vpop.f32.mrf.mxu0 }
  0x87   :  { %v66_v5 = vadd.f32 %v63_v4, %v36_v3 }
  0x89   :  { %68 = vst.msk [vmem:[#allocation2] sm:$0x1] %vm34_vm0, %v66_v5 }
  0x90   :  { %v72_v7 = vld [vmem:[#allocation2] sm:$0x1] }
  0x91   :  { %v75_v8 = vadd.f32 %v74_v6, %v72_v7 }
  0x93   :  { %76 = vst.msk [vmem:[#allocation7] sm:$0x1] %vm34_vm0, %v75_v8 }
  0x94   :  { %87 = dma.vmem_to_hbm [thread:$0]  %s83_s21, 16, %s85_s24, [#allocation6]  }
  0x95   :  { %149 = dma.done.wait [#allocation6], 16  }
  0x96   :  { %150 = vsyncadd [#allocation6], 4294967280 }
  0x97   :  { %92 = vsyncpa [#allocation5], 1 }
  0x98   :  { %93 = vsyncpa [#allocation6], 1 }

</bundles_post_ra>
